<compile_context>
chip_gen: v5e
topology: v5e:2x2
jax: 0.10.0
libtpu: 0.0.40
codegen_flags: <defaults>
</compile_context>

<pallas_src>
import jax
import jax.numpy as jnp
from jax.experimental import pallas as pl
from jax.experimental.pallas import tpu as pltpu

# ---- Config (MNIST-style FullyConnected) -----------------------------------
DATASET_MEAN = 0.1307      # Normalization buffers for dataset='mnist'
DATASET_SIGMA = 0.3081
INPUT_SHAPE = (1, 28, 28)  # (C, H, W)
FC_LAYERS = (32, 32, 10)   # hidden, hidden, output
BATCH = 2

LANE = 128                 # TPU lane width


def _round_up(x, m):
    return (x + m - 1) // m * m


def _max_batch_tile():
    """Per-generation batch-tile cap so f32 input tiles fit the default scoped VMEM."""
    kind = ""
    try:
        kind = jax.devices()[0].device_kind.lower()
    except Exception:
        pass
    if ("v6" in kind) or ("v7" in kind) or ("7x" in kind):
        return 2048   # 32 MiB default scoped VMEM: ~2*6.4 MB double-buffered f32 x-tiles OK
    return 1024       # v5e (16 MiB default scoped) / unknown: conservative


def _pick_tm(B):
    cap = _max_batch_tile()
    if B <= 256:
        # Tiny batches: a single sublane/bf16-friendly tile (multiple of 16 rows).
        return _round_up(max(B, 16), 16)
    # Large batches: biggest tile under the per-gen cap, but keep >= 2 balanced grid
    # steps so the 'parallel' batch axis can feed both v7x TensorCores.
    return min(cap, _round_up(pl.cdiv(B, 2), 16))


# ---- Kernel -----------------------------------------------------------------
def _fc_kernel(x_ref, w1_ref, b1_ref, w2_ref, b2_ref, w3_ref, b3_ref, o_ref):
    """One batch tile: 3x (matmul + bias) with ReLU between (normalization pre-folded)."""
    x = x_ref[...].astype(jnp.bfloat16)          # f32 HBM stream, cast in-register
    h = jnp.dot(x, w1_ref[...], preferred_element_type=jnp.float32)
    h = jnp.maximum(h + b1_ref[...], 0.0).astype(jnp.bfloat16)

    h = jnp.dot(h, w2_ref[...], preferred_element_type=jnp.float32)
    h = jnp.maximum(h + b2_ref[...], 0.0).astype(jnp.bfloat16)

    o_ref[...] = (
        jnp.dot(h, w3_ref[...], preferred_element_type=jnp.float32) + b3_ref[...]
    ).astype(o_ref.dtype)


# ---- Host-side parameter prep ------------------------------------------------
def prepare_params(params, mean, sigma):
    """PyTorch-layout params (W [out,in], b [out]) -> kernel params.

    - Folds (x - mean)/sigma into layer-1:  w1' = w1_t/sigma,
      b1' = b1 - (mean/sigma) * w1_t.sum(axis=0)
    - Transposes weights to [in, out], zero-pads feature dims to 128 lanes.
    - Weights cast to bf16; biases stay f32 as [1, out_pad].
    """
    prepped = []
    for idx, (w, b) in enumerate(params):
        w_t = w.T.astype(jnp.float32)          # [in, out]
        b = b.astype(jnp.float32)
        if idx == 0:
            b = b - (mean / sigma) * w_t.sum(axis=0)
            w_t = w_t / sigma
        in_dim, out_dim = w_t.shape
        out_pad = _round_up(out_dim, LANE)
        in_pad = in_dim if idx == 0 else _round_up(in_dim, LANE)
        w_p = jnp.zeros((in_pad, out_pad), jnp.float32).at[:in_dim, :out_dim].set(w_t)
        b_p = jnp.zeros((1, out_pad), jnp.float32).at[0, :out_dim].set(b)
        prepped.append((w_p.astype(jnp.bfloat16), b_p))
    return prepped


# ---- Wrapper -----------------------------------------------------------------
def fully_connected_forward(x_nchw, kernel_params, fc_layers):
    """x_nchw: [B, C, H, W] float32. kernel_params: from prepare_params()."""
    B = x_nchw.shape[0]
    d_in = x_nchw.shape[1] * x_nchw.shape[2] * x_nchw.shape[3]
    x_flat = x_nchw.reshape(B, d_in)             # nn.Flatten (layout glue), stays f32

    (w1, b1), (w2, b2), (w3, b3) = kernel_params
    out_pad = w3.shape[1]
    h1, h2, out_dim = fc_layers

    tm = _pick_tm(B)
    grid = (pl.cdiv(B, tm),)                     # boundary tile masked by Pallas; no pad pass

    # Advisory cost estimate with real (unpadded) dims.
    flops = 2 * B * (d_in * h1 + h1 * h2 + h2 * out_dim)
    bytes_accessed = (
        B * d_in * 4                               # f32 activations in
        + B * out_dim * 2                          # bf16 logits out (real cols)
        + (d_in * h1 + h1 * h2 + h2 * out_dim) * 2 # bf16 weights
        + (h1 + h2 + out_dim) * 4                  # f32 biases
    )
    cost = pl.CostEstimate(
        flops=flops, transcendentals=0, bytes_accessed=bytes_accessed
    )

    def resident(shape):
        return pl.BlockSpec(shape, lambda i: (0, 0))

    out_padded = pl.pallas_call(
        _fc_kernel,
        out_shape=jax.ShapeDtypeStruct((B, out_pad), jnp.bfloat16),
        grid=grid,
        in_specs=[
            pl.BlockSpec((tm, d_in), lambda i: (i, 0)),     # streamed f32 batch tiles
            resident(w1.shape), resident(b1.shape),         # VMEM-resident weights/biases
            resident(w2.shape), resident(b2.shape),
            resident(w3.shape), resident(b3.shape),
        ],
        out_specs=pl.BlockSpec((tm, out_pad), jnp.bfloat16 and (lambda i: (i, 0))),
        compiler_params=pltpu.CompilerParams(
            dimension_semantics=("parallel",),              # megacore-shardable on v7x
        ),
        cost_estimate=cost,
    )(x_flat, w1, b1, w2, b2, w3, b3)

    return out_padded[:B, :out_dim]


# ---- Init & reference (PyTorch layout, f32) ----------------------------------
def init_params(key, d_in, fc_layers):
    """nn.Linear default init: U(-1/sqrt(in), 1/sqrt(in)); PyTorch layout."""
    params = []
    prev = d_in
    for fc_size in fc_layers:
        key, kw, kb = jax.random.split(key, 3)
        bound = 1.0 / jnp.sqrt(float(prev))
        w = jax.random.uniform(kw, (fc_size, prev), jnp.float32, -bound, bound)
        b = jax.random.uniform(kb, (fc_size,), jnp.float32, -bound, bound)
        params.append((w, b))
        prev = fc_size
    return params


def reference_forward(x_nchw, params):
    """Pure-JAX f32 reference mirroring the PyTorch module (normalize/flatten/linears)."""
    B = x_nchw.shape[0]
    h = (x_nchw - DATASET_MEAN) / DATASET_SIGMA
    h = h.reshape(B, -1)
    n = len(params)
    for i, (w, b) in enumerate(params):
        h = h @ w.T + b
        if i + 1 < n:
            h = jnp.maximum(h, 0.0)
    return h


if __name__ == "__main__":
    key = jax.random.PRNGKey(0)
    k_x, k_p = jax.random.split(key)

    x = jax.random.uniform(
        k_x, (BATCH,) + INPUT_SHAPE, jnp.float32, 0.0, 1.0
    )  # NCHW, MNIST-like in [0, 1]

    d_in = INPUT_SHAPE[0] * INPUT_SHAPE[1] * INPUT_SHAPE[2]
    params = init_params(k_p, d_in, FC_LAYERS)
    kernel_params = prepare_params(params, DATASET_MEAN, DATASET_SIGMA)

    out = fully_connected_forward(x, kernel_params, FC_LAYERS)
    out = jax.block_until_ready(out)

    ref = reference_forward(x, params)
    assert out.shape == (BATCH, FC_LAYERS[-1])
    # bf16 weights/activations/output with f32 accumulation: loosened tolerance.
    assert jnp.allclose(out.astype(jnp.float32), ref, atol=3e-2, rtol=3e-2), (
        "mismatch vs reference"
    )

    # TODO(synk): ReLU6 / linear / skip-norm constructor variants are config flags of the
    # PyTorch module; only the default (normalize=True, ReLU, non-linear) path is implemented.
    print("KERNEL_OK")
</pallas_src>

<mosaic_0001>
module attributes {stable_mosaic.version = 11 : i64} {
  func.func @_fc_kernel(%arg0: i32, %arg1: memref<16x784xf32, #tpu.memory_space<vmem>>, %arg2: memref<784x128xbf16, #tpu.memory_space<vmem>>, %arg3: memref<1x128xf32, #tpu.memory_space<vmem>>, %arg4: memref<128x128xbf16, #tpu.memory_space<vmem>>, %arg5: memref<1x128xf32, #tpu.memory_space<vmem>>, %arg6: memref<128x128xbf16, #tpu.memory_space<vmem>>, %arg7: memref<1x128xf32, #tpu.memory_space<vmem>>, %arg8: memref<16x128xbf16, #tpu.memory_space<vmem>>) attributes {dimension_semantics = [#tpu.dimension_semantics<parallel>], iteration_bounds = array<i64: 1>, scalar_prefetch = 0 : i64, scratch_operands = 0 : i64, tpu.core_type = #tpu.core_type<tc>, window_params = [{transform_indices = @transform_0, window_bounds = array<i64: 16, 784>}, {pipeline_mode = #tpu.pipeline_mode<synchronous>, transform_indices = @transform_1, window_bounds = array<i64: 784, 128>}, {pipeline_mode = #tpu.pipeline_mode<synchronous>, transform_indices = @transform_2, window_bounds = array<i64: 1, 128>}, {pipeline_mode = #tpu.pipeline_mode<synchronous>, transform_indices = @transform_3, window_bounds = array<i64: 128, 128>}, {pipeline_mode = #tpu.pipeline_mode<synchronous>, transform_indices = @transform_4, window_bounds = array<i64: 1, 128>}, {pipeline_mode = #tpu.pipeline_mode<synchronous>, transform_indices = @transform_5, window_bounds = array<i64: 128, 128>}, {pipeline_mode = #tpu.pipeline_mode<synchronous>, transform_indices = @transform_6, window_bounds = array<i64: 1, 128>}, {transform_indices = @transform_7, window_bounds = array<i64: 16, 128>}]} {
    %c0 = arith.constant 0 : index
    %c0_0 = arith.constant 0 : index
    %0 = vector.load %arg1[%c0, %c0_0] : memref<16x784xf32, #tpu.memory_space<vmem>>, vector<16x784xf32>
    %1 = arith.truncf %0 : vector<16x784xf32> to vector<16x784xbf16>
    %c0_1 = arith.constant 0 : index
    %c0_2 = arith.constant 0 : index
    %2 = vector.load %arg2[%c0_1, %c0_2] : memref<784x128xbf16, #tpu.memory_space<vmem>>, vector<784x128xbf16>
    %cst = arith.constant dense<0.000000e+00> : vector<16x128xf32>
    %3 = tpu.matmul %1, %2, %cst {dimension_numbers = #tpu.dot_dimension_numbers<[1], [0], [0], [1], [0, 0, 1, 1], [], []>} : vector<16x784xbf16>, vector<784x128xbf16>, vector<16x128xf32> -> vector<16x128xf32>
    %c0_3 = arith.constant 0 : index
    %c0_4 = arith.constant 0 : index
    %4 = vector.load %arg3[%c0_3, %c0_4] : memref<1x128xf32, #tpu.memory_space<vmem>>, vector<1x128xf32>
    %5 = vector.broadcast %4 : vector<1x128xf32> to vector<16x128xf32>
    %6 = arith.addf %3, %5 : vector<16x128xf32>
    %cst_5 = arith.constant 0.000000e+00 : f32
    %7 = vector.broadcast %cst_5 : f32 to vector<16x128xf32>
    %8 = arith.maximumf %6, %7 : vector<16x128xf32>
    %9 = arith.truncf %8 : vector<16x128xf32> to vector<16x128xbf16>
    %c0_6 = arith.constant 0 : index
    %c0_7 = arith.constant 0 : index
    %10 = vector.load %arg4[%c0_6, %c0_7] : memref<128x128xbf16, #tpu.memory_space<vmem>>, vector<128x128xbf16>
    %cst_8 = arith.constant dense<0.000000e+00> : vector<16x128xf32>
    %11 = tpu.matmul %9, %10, %cst_8 {dimension_numbers = #tpu.dot_dimension_numbers<[1], [0], [0], [1], [0, 0, 1, 1], [], []>} : vector<16x128xbf16>, vector<128x128xbf16>, vector<16x128xf32> -> vector<16x128xf32>
    %c0_9 = arith.constant 0 : index
    %c0_10 = arith.constant 0 : index
    %12 = vector.load %arg5[%c0_9, %c0_10] : memref<1x128xf32, #tpu.memory_space<vmem>>, vector<1x128xf32>
    %13 = vector.broadcast %12 : vector<1x128xf32> to vector<16x128xf32>
    %14 = arith.addf %11, %13 : vector<16x128xf32>
    %cst_11 = arith.constant 0.000000e+00 : f32
    %15 = vector.broadcast %cst_11 : f32 to vector<16x128xf32>
    %16 = arith.maximumf %14, %15 : vector<16x128xf32>
    %17 = arith.truncf %16 : vector<16x128xf32> to vector<16x128xbf16>
    %c0_12 = arith.constant 0 : index
    %c0_13 = arith.constant 0 : index
    %18 = vector.load %arg6[%c0_12, %c0_13] : memref<128x128xbf16, #tpu.memory_space<vmem>>, vector<128x128xbf16>
    %cst_14 = arith.constant dense<0.000000e+00> : vector<16x128xf32>
    %19 = tpu.matmul %17, %18, %cst_14 {dimension_numbers = #tpu.dot_dimension_numbers<[1], [0], [0], [1], [0, 0, 1, 1], [], []>} : vector<16x128xbf16>, vector<128x128xbf16>, vector<16x128xf32> -> vector<16x128xf32>
    %c0_15 = arith.constant 0 : index
    %c0_16 = arith.constant 0 : index
    %20 = vector.load %arg7[%c0_15, %c0_16] : memref<1x128xf32, #tpu.memory_space<vmem>>, vector<1x128xf32>
    %21 = vector.broadcast %20 : vector<1x128xf32> to vector<16x128xf32>
    %22 = arith.addf %19, %21 : vector<16x128xf32>
    %23 = arith.truncf %22 : vector<16x128xf32> to vector<16x128xbf16>
    %c0_17 = arith.constant 0 : index
    %c0_18 = arith.constant 0 : index
    %24 = vector.load %arg8[%c0_17, %c0_18] : memref<16x128xbf16, #tpu.memory_space<vmem>>, vector<16x128xbf16>
    tpu.vector_store %arg8[%c0_17, %c0_18], %23 {strides = array<i32>} : memref<16x128xbf16, #tpu.memory_space<vmem>>, vector<16x128xbf16>,
    return
  }
  func.func @transform_0(%arg0: i32) -> (i32, i32) {
    %c0_i32 = arith.constant 0 : i32
    %c0_i32_0 = arith.constant 0 : i32
    return %arg0, %c0_i32 : i32, i32
  }
  func.func @transform_1(%arg0: i32) -> (i32, i32) {
    %c0_i32 = arith.constant 0 : i32
    %c0_i32_0 = arith.constant 0 : i32
    %c0_i32_1 = arith.constant 0 : i32
    return %c0_i32, %c0_i32_0 : i32, i32
  }
  func.func @transform_2(%arg0: i32) -> (i32, i32) {
    %c0_i32 = arith.constant 0 : i32
    %c0_i32_0 = arith.constant 0 : i32
    %c0_i32_1 = arith.constant 0 : i32
    return %c0_i32, %c0_i32_0 : i32, i32
  }
  func.func @transform_3(%arg0: i32) -> (i32, i32) {
    %c0_i32 = arith.constant 0 : i32
    %c0_i32_0 = arith.constant 0 : i32
    %c0_i32_1 = arith.constant 0 : i32
    return %c0_i32, %c0_i32_0 : i32, i32
  }
  func.func @transform_4(%arg0: i32) -> (i32, i32) {
    %c0_i32 = arith.constant 0 : i32
    %c0_i32_0 = arith.constant 0 : i32
    %c0_i32_1 = arith.constant 0 : i32
    return %c0_i32, %c0_i32_0 : i32, i32
  }
  func.func @transform_5(%arg0: i32) -> (i32, i32) {
    %c0_i32 = arith.constant 0 : i32
    %c0_i32_0 = arith.constant 0 : i32
    %c0_i32_1 = arith.constant 0 : i32
    return %c0_i32, %c0_i32_0 : i32, i32
  }
  func.func @transform_6(%arg0: i32) -> (i32, i32) {
    %c0_i32 = arith.constant 0 : i32
    %c0_i32_0 = arith.constant 0 : i32
    %c0_i32_1 = arith.constant 0 : i32
    return %c0_i32, %c0_i32_0 : i32, i32
  }
  func.func @transform_7(%arg0: i32) -> (i32, i32) {
    %c0_i32 = arith.constant 0 : i32
    %c0_i32_0 = arith.constant 0 : i32
    return %arg0, %c0_i32 : i32, i32
  }
}

</mosaic_0001>

<bundles_post_ra>
// kernel: tpu_custom_call.1
= control target key start
LH: loop header
LB: loop body
LE: loop exit
PB: predicated region body
PF: predicated region fallthrough
CT: control target
= control target key end

     0   :  { %12 = vsyncpa [#allocation3], 0  ;;  %s1471_s0 = inlined_call_operand.hbm [shape: f32[2,784], index: 0, kind: input, shape index: {}]   ;;  %s1472_s1 = inlined_call_operand.hbm [shape: bf16[784,128], index: 1, kind: input, shape index: {}]   ;;  %s1473_s2 = inlined_call_operand.vmem [shape: f32[1,128], index: 2, kind: input, shape index: {}]   ;;  %s1474_s3 = inlined_call_operand.hbm [shape: bf16[128,128], index: 3, kind: input, shape index: {}]   ;;  %s1475_s4 = inlined_call_operand.vmem [shape: f32[1,128], index: 4, kind: input, shape index: {}]   ;;  %s1476_s5 = inlined_call_operand.hbm [shape: bf16[128,128], index: 5, kind: input, shape index: {}]   ;;  %s1477_s6 = inlined_call_operand.vmem [shape: f32[1,128], index: 6, kind: input, shape index: {}]   ;;  %s1478_s7 = inlined_call_operand.hbm [shape: bf16[2,128], index: 7, kind: output, shape index: {}]  }
   0x1   :  { %13 = vsyncpa [#allocation6], 0 }
   0x2   :  { %14 = vsyncpa [#allocation9], 0 }
   0x3   :  { %15 = vsyncpa [#allocation4], 0  ;;  %s33_s26 = sshll.u32 %s1472_s1, 4  ;;  %s34_s26 = int_to_ptr.hbm [resolvable:$true] %s33_s26 }
   0x4   :  { %19 = vsyncadd [#allocation3], 1568  ;;  %s1388_s27 = smov [#allocation5]   ;;  %s20_s8 = sshll.u32 %s1471_s0, 4  ;;  %s21_s8 = int_to_ptr.hbm [resolvable:$true] %s20_s8 }
   0x5   :  { %s35_s28 = sshll.u32 %s1388_s27, 4  ;;  %s1389_s9 = smov 64   ;;  %s36_s28 = int_to_ptr.vmem [resolvable:$true] %s35_s28 }
   0x6   :  { %s1390_s10 = smov 4   ;;  %s1391_s11 = smov [#allocation2]  }
   0x7   :  { %41 = dma.hbm_to_vmem [thread:$0]  %s34_s26, 6272, %s36_s28, [#allocation6], %s1389_s9, %s1389_s9, %s1390_s10  }
   0x8   :  { %s22_s12 = sshll.u32 %s1391_s11, 4  ;;  %s1392_s13 = smov 224   ;;  %s23_s12 = int_to_ptr.vmem [resolvable:$true] %s22_s12 }
   0x9   :  { %s1393_s14 = smov 14   ;;  %s48_s16 = sshll.u32 %s1474_s3, 4  ;;  %s49_s16 = int_to_ptr.hbm [resolvable:$true] %s48_s16 }
   0xa   :  { %28 = dma.hbm_to_vmem [thread:$0]  %s21_s8, 224, %s23_s12, [#allocation3], %s1392_s13, %s1392_s13, %s1393_s14  }
   0xb   :  { %s1394_s17 = smov [#allocation7]   ;;  %s63_s20 = sshll.u32 %s1476_s5, 4  ;;  %s64_s20 = int_to_ptr.hbm [resolvable:$true] %s63_s20 }
   0xc   :  { %s50_s18 = sshll.u32 %s1394_s17, 4  ;;  %s1395_s21 = smov [#allocation8]   ;;  %s51_s18 = int_to_ptr.vmem [resolvable:$true] %s50_s18 }
   0xd   :  { %56 = dma.hbm_to_vmem [thread:$0]  %s49_s16, 1024, %s51_s18, [#allocation6], %s1389_s9, %s1389_s9, %s1390_s10  }
   0xe   :  { %s65_s22 = sshll.u32 %s1395_s21, 4  ;;  %s66_s22 = int_to_ptr.vmem [resolvable:$true] %s65_s22 }
   0xf   :  { %71 = dma.hbm_to_vmem [thread:$0]  %s64_s20, 1024, %s66_s22, [#allocation9], %s1389_s9, %s1389_s9, %s1390_s10  }
  0x10   :  { %1380 = dma.done.wait [#allocation3], 1792  }
  0x11   :  { %1381 = vsyncadd [#allocation3], 4294965504 }
  0x12   :  { %1382 = dma.done.wait [#allocation6], 7296  }
  0x13   :  { %1383 = vsyncadd [#allocation6], 4294960000 }
  0x14   :  { %1384 = dma.done.wait [#allocation9], 1024  }
  0x15   :  { %1385 = vsyncadd [#allocation9], 4294966272  ;;  %v1188_v0 = vld [vmem:[#allocation5 + $0x38] sm:$0xff]  ;;  %v1187_v4 = vld [vmem:[#allocation5 + $0x30] sm:$0xff]  ;;  %vm577_vm0 = vcmask 130048   ;;  %vm855_vm1 = vcmask 1040384  }
  0x16   :  { %v1196_v1 = vld [vmem:[#allocation5 + $0x78] sm:$0xff]  ;;  %581 = vmatpush.bf16.msra.mxu0 %v1188_v0  ;;  %v1195_v5 = vld [vmem:[#allocation5 + $0x70] sm:$0xff]  ;;  %v1186_v8 = vld [vmem:[#allocation5 + $0x28] sm:$0xff]  ;;  %vm859_vm2 = vcmask 1041409   ;;  %vm863_vm3 = vcmask 1042434   ;;  %vm867_vm4 = vcmask 1043459  }
  0x17   :  { %v1204_v2 = vld [vmem:[#allocation5 + $0xb8] sm:$0xff]  ;;  %595 = vmatpush.bf16.msra.mxu1 %v1196_v1  ;;  %v1203_v6 = vld [vmem:[#allocation5 + $0xb0] sm:$0xff]  ;;  %v1194_v9 = vld [vmem:[#allocation5 + $0x68] sm:$0xff] }
  0x18   :  { %v1212_v3 = vld [vmem:[#allocation5 + $0xf8] sm:$0xff]  ;;  %609 = vmatpush.bf16.msra.mxu2 %v1204_v2  ;;  %v1211_v7 = vld [vmem:[#allocation5 + $0xf0] sm:$0xff]  ;;  %v1202_v10 = vld [vmem:[#allocation5 + $0xa8] sm:$0xff] }
  0x19   :  { %623 = vmatpush.bf16.msra.mxu3 %v1212_v3  ;;  %v1210_v11 = vld [vmem:[#allocation5 + $0xe8] sm:$0xff]  ;;  %v1185_v12 = vld [vmem:[#allocation5 + $0x20] sm:$0xff]  ;;  %v91_v16 = vld [vmem:[#allocation2] sm:$0xff] }
  0x1a   :  { %582 = vmatpush.bf16.msra.mxu0 %v1187_v4  ;;  %v1193_v13 = vld [vmem:[#allocation5 + $0x60] sm:$0xff]  ;;  %v95_v18 = vld [vmem:[#allocation2 + $0x1c] sm:$0xff]  ;;  %123 = vst [vmem:[#allocation1] ss:$4 sm:$0xff] %v91_v16  ;;  %v1184_v20 = vld [vmem:[#allocation5 + $0x18] sm:$0xff] }
  0x1b   :  { %596 = vmatpush.bf16.msra.mxu1 %v1195_v5  ;;  %v1201_v14 = vld [vmem:[#allocation5 + $0xa0] sm:$0xff]  ;;  %v1192_v21 = vld [vmem:[#allocation5 + $0x58] sm:$0xff]  ;;  %127 = vst [vmem:[#allocation1 + $0x2] ss:$4 sm:$0xff] %v95_v18  ;;  %v1183_v25 = vld [vmem:[#allocation5 + $0x10] sm:$0xff] }
  0x1c   :  { %610 = vmatpush.bf16.msra.mxu2 %v1203_v6  ;;  %v1209_v15 = vld [vmem:[#allocation5 + $0xe0] sm:$0xff]  ;;  %v1200_v22 = vld [vmem:[#allocation5 + $0x98] sm:$0xff]  ;;  %v1191_v26 = vld [vmem:[#allocation5 + $0x50] sm:$0xff] }
  0x1d   :  { %624 = vmatpush.bf16.msra.mxu3 %v1211_v7  ;;  %v93_v17 = vld [vmem:[#allocation2 + $0xe] sm:$0xff]  ;;  %v92_v24 = vld [vmem:[#allocation2 + $0x8] sm:$0x3f]  ;;  %v94_v27 = vld [vmem:[#allocation2 + $0x16] sm:$0x3f] }
  0x1e   :  { %583 = vmatpush.bf16.msra.mxu0 %v1186_v8  ;;  %v97_v19 = vld [vmem:[#allocation2 + $0x2a] sm:$0xff]  ;;  %125 = vst [vmem:[#allocation1 + $0x1] ss:$4 sm:$0xff] %v93_v17  ;;  %v1199_v28 = vld [vmem:[#allocation5 + $0x90] sm:$0xff]  ;;  %v1182_v31 = vld [vmem:[#allocation5 + $0x8] sm:$0xff] }
  0x1f   :  { %597 = vmatpush.bf16.msra.mxu1 %v1194_v9  ;;  %v1208_v23 = vld [vmem:[#allocation5 + $0xd8] sm:$0xff]  ;;  %129 = vst [vmem:[#allocation1 + $0x3] ss:$4 sm:$0xff] %v97_v19  ;;  %v1207_v29 = vld [vmem:[#allocation5 + $0xd0] sm:$0xff]  ;;  %v1190_v32 = vld [vmem:[#allocation5 + $0x48] sm:$0xff] }
  0x20   :  { %611 = vmatpush.bf16.msra.mxu2 %v1202_v10  ;;  %v96_v30 = vld [vmem:[#allocation2 + $0x24] sm:$0x3f]  ;;  %v99_v33 = vld [vmem:[#allocation2 + $0x38] sm:$0xff]  ;;  %131 = vst [vmem:[#allocation1 + $0x20] ss:$4 sm:$0xff] %v92_v24  ;;  %v1181_v43 = vld [vmem:[#allocation5] sm:$0xff] }
  0x21   :  { %625 = vmatpush.bf16.msra.mxu3 %v1210_v11  ;;  %v1198_v34 = vld [vmem:[#allocation5 + $0x88] sm:$0xff]  ;;  %133 = vst [vmem:[#allocation1 + $0x21] ss:$4 sm:$0xff] %v94_v27  ;;  %v101_v36 = vld [vmem:[#allocation2 + $0x46] sm:$0xff]  ;;  %v1189_v44 = vld [vmem:[#allocation5 + $0x40] sm:$0xff] }
  0x22   :  { %584 = vmatpush.bf16.msra.mxu0 %v1185_v12  ;;  %v1206_v35 = vld [vmem:[#allocation5 + $0xc8] sm:$0xff]  ;;  %135 = vst [vmem:[#allocation1 + $0x22] ss:$4 sm:$0xff] %v96_v30  ;;  %v105_v42 = vld [vmem:[#allocation2 + $0x62] sm:$0xff]  ;;  %v98_v45 = vld [vmem:[#allocation2 + $0x32] sm:$0x3f] }
  0x23   :  { %598 = vmatpush.bf16.msra.mxu1 %v1193_v13  ;;  %v103_v37 = vld [vmem:[#allocation2 + $0x54] sm:$0xff]  ;;  %v1220_v46 = vld [vmem:[#allocation5 + $0x138] sm:$0xff]  ;;  %137 = vst [vmem:[#allocation1 + $0x23] ss:$4 sm:$0xff] %v98_v45  ;;  %v1219_v51 = vld [vmem:[#allocation5 + $0x130] sm:$0xff] }
  0x24   :  { %612 = vmatpush.bf16.msra.mxu2 %v1201_v14  ;;  %v1228_v47 = vld [vmem:[#allocation5 + $0x178] sm:$0xff]  ;;  %v1197_v48 = vld [vmem:[#allocation5 + $0x80] sm:$0xff]  ;;  %v1227_v52 = vld [vmem:[#allocation5 + $0x170] sm:$0xff] }
  0x25   :  { %626 = vmatpush.bf16.msra.mxu3 %v1209_v15  ;;  %v1205_v49 = vld [vmem:[#allocation5 + $0xc0] sm:$0xff]  ;;  %v1218_v53 = vld [vmem:[#allocation5 + $0x128] sm:$0xff]  ;;  %v100_v55 = vld [vmem:[#allocation2 + $0x40] sm:$0x3f] }
  0x26   :  { %585 = vmatpush.bf16.msra.mxu0 %v1184_v20  ;;  %v138_v38 = vld.sshfl [vmem:[#allocation1] sm:$0xff pattern:$0x73625140]  ;;  %v139_v39 = vld.sshfl [vmem:[#allocation1 + $0x8] sm:$0xff pattern:$0x73625140] }
  0x27   :  { %599 = vmatpush.bf16.msra.mxu1 %v1192_v21  ;;  %v140_v40 = vld.sshfl [vmem:[#allocation1 + $0x10] sm:$0xff pattern:$0x73625140]  ;;  %v141_v41 = vld.sshfl [vmem:[#allocation1 + $0x18] sm:$0xff pattern:$0x73625140] }
  0x28   :  { %613 = vmatpush.bf16.msra.mxu2 %v1200_v22  ;;  %145 = vst [vmem:[#allocation1] ss:$4 sm:$0xff] %v99_v33  ;;  %v1229_v50 = vld [vmem:[#allocation5 + $0x180] sm:$0xff]  ;;  %v1226_v54 = vld [vmem:[#allocation5 + $0x168] sm:$0xff]  ;;  %v106_v6 = vld [vmem:[#allocation2 + $0x6a] sm:$0x3f] }
  0x29   :  { %627 = vmatpush.bf16.msra.mxu3 %v1208_v23  ;;  %146 = vst [vmem:[#allocation1 + $0x1] ss:$4 sm:$0xff] %v101_v36  ;;  %v102_v58 = vld [vmem:[#allocation2 + $0x4e] sm:$0x3f]  ;;  %v104_v3 = vld [vmem:[#allocation2 + $0x5c] sm:$0x3f] }
  0x2a   :  { %586 = vmatpush.bf16.msra.mxu0 %v1183_v25  ;;  %147 = vst [vmem:[#allocation1 + $0x2] ss:$4 sm:$0xff] %v103_v37  ;;  %v142_v1 = vld.sshfl [vmem:[#allocation1 + $0x20] sm:$0xff pattern:$0x73625140]  ;;  %v1217_v5 = vld [vmem:[#allocation5 + $0x120] sm:$0xff] }
  0x2b   :  { %600 = vmatpush.bf16.msra.mxu1 %v1191_v26  ;;  %148 = vst [vmem:[#allocation1 + $0x3] ss:$4 sm:$0xff] %v105_v42  ;;  %v143_v2 = vld.sshfl [vmem:[#allocation1 + $0x28] sm:$0xff pattern:$0x73625140]  ;;  %v1225_v7 = vld [vmem:[#allocation5 + $0x160] sm:$0xff] }
  0x2c   :  { %614 = vmatpush.bf16.msra.mxu2 %v1199_v28  ;;  %v144_v4 = vld.sshfl [vmem:[#allocation1 + $0x30] sm:$0xff pattern:$0x73625140]  ;;  %v1215_v10 = vld [vmem:[#allocation5 + $0x110] sm:$0xff]  ;;  %v1214_v14 = vld [vmem:[#allocation5 + $0x108] sm:$0xff] }
  0x2d   :  { %628 = vmatpush.bf16.msra.mxu3 %v1207_v29  ;;  %149 = vst [vmem:[#allocation1 + $0x20] ss:$4 sm:$0xff] %v100_v55  ;;  %v1216_v8 = vld [vmem:[#allocation5 + $0x118] sm:$0xff]  ;;  %v1223_v11 = vld [vmem:[#allocation5 + $0x150] sm:$0xff]  ;;  %v1222_v15 = vld [vmem:[#allocation5 + $0x148] sm:$0xff] }
  0x2e   :  { %587 = vmatpush.bf16.msra.mxu0 %v1182_v31  ;;  %150 = vst [vmem:[#allocation1 + $0x21] ss:$4 sm:$0xff] %v102_v58  ;;  %v1224_v9 = vld [vmem:[#allocation5 + $0x158] sm:$0xff]  ;;  %v1213_v16 = vld [vmem:[#allocation5 + $0x100] sm:$0xff]  ;;  %v1235_v24 = vld [vmem:[#allocation7 + $0x28] sm:$0xff] }
  0x2f   :  { %601 = vmatpush.bf16.msra.mxu1 %v1190_v32  ;;  %151 = vst [vmem:[#allocation1 + $0x22] ss:$4 sm:$0xff] %v104_v3  ;;  %v1221_v18 = vld [vmem:[#allocation5 + $0x140] sm:$0xff]  ;;  %v1236_v23 = vld [vmem:[#allocation7 + $0x30] sm:$0xff]  ;;  %v1234_v25 = vld [vmem:[#allocation7 + $0x20] sm:$0xff] }
  0x30   :  { %615 = vmatpush.bf16.msra.mxu2 %v1198_v34  ;;  %152 = vst [vmem:[#allocation1 + $0x23] ss:$4 sm:$0xff] %v106_v6  ;;  %v1237_v22 = vld [vmem:[#allocation7 + $0x38] sm:$0xff]  ;;  %v1232_v27 = vld [vmem:[#allocation7 + $0x10] sm:$0xff]  ;;  %v1231_v28 = vld [vmem:[#allocation7 + $0x8] sm:$0xff] }
  0x31   :  { %629 = vmatpush.bf16.msra.mxu3 %v1206_v35  ;;  %v1233_v26 = vld [vmem:[#allocation7 + $0x18] sm:$0xff]  ;;  %v1230_v32 = vld [vmem:[#allocation7] sm:$0xff]  ;;  %v1244_v36 = vld [vmem:[#allocation8 + $0x30] sm:$0xff] }
  0x32   :  { %588 = vmatpush.bf16.msra.mxu0 %v1181_v43  ;;  %v155_v56 = vld.sshfl [vmem:[#allocation1 + $0x10] sm:$0xff pattern:$0x73625140]  ;;  %v153_v57 = vld.sshfl [vmem:[#allocation1] sm:$0xff pattern:$0x73625140] }
  0x33   :  { %602 = vmatpush.bf16.msra.mxu1 %v1189_v44  ;;  %v176_v59 = vpack.c.bf16 %v155_v56, %v140_v40  ;;  %v174_v60 = vpack.c.bf16 %v153_v57, %v138_v38  ;;  %v156_v61 = vld.sshfl [vmem:[#allocation1 + $0x18] sm:$0xff pattern:$0x73625140]  ;;  %v154_v62 = vld.sshfl [vmem:[#allocation1 + $0x8] sm:$0xff pattern:$0x73625140] }
  0x34   :  { %616 = vmatpush.bf16.msra.mxu2 %v1197_v48  ;;  %v177_v63 = vpack.c.bf16 %v156_v61, %v141_v41  ;;  %v175_v0 = vpack.c.bf16 %v154_v62, %v139_v39  ;;  %v1257_v33 = vld [vmem:[%s1473_s2] ss:$0 sm:$0xff]  ;;  %v1245_v34 = vld [vmem:[#allocation8 + $0x38] sm:$0xff]  ;;  %v1243_v41 = vld [vmem:[#allocation8 + $0x28] sm:$0xff] }
  0x35   :  { %630 = vmatpush.bf16.msra.mxu3 %v1205_v49  ;;  %589 = vmatmul.bf16.vlgmr.msra.gmra.mxu0 %v174_v60  ;;  %v1242_v45 = vld [vmem:[#allocation8 + $0x20] sm:$0xff]  ;;  %v1240_v3 = vld [vmem:[#allocation8 + $0x10] sm:$0xff] }
  0x36   :  { %637 = vmatpush.bf16.msrb.mxu0 %v1220_v46  ;;  %603 = vmatmul.bf16.vlgmr.msra.gmra.mxu1 %v175_v0 }
  0x37   :  { %651 = vmatpush.bf16.msrb.mxu1 %v1228_v47  ;;  %617 = vmatmul.bf16.vlgmr.msra.gmra.mxu2 %v176_v59  ;;  %v159_v12 = vld.sshfl [vmem:[#allocation1 + $0x30] sm:$0xff pattern:$0x73625140]  ;;  %v157_v17 = vld.sshfl [vmem:[#allocation1 + $0x20] sm:$0xff pattern:$0x73625140] }
  0x38   :  { %672 = vmatpush.bf16.msrb.mxu2 %v1229_v50  ;;  %631 = vmatmul.bf16.vlgmr.msra.gmra.mxu3 %v177_v63  ;;  %v180_v13 = vpack.c.bf16 %v159_v12, %v144_v4  ;;  %v158_v19 = vld.sshfl [vmem:[#allocation1 + $0x28] sm:$0xff pattern:$0x73625140]  ;;  %v178_v20 = vpack.c.bf16 %v157_v17, %v142_v1 }
  0x39   :  { %v179_v21 = vpack.c.bf16 %v158_v19, %v143_v2  ;;  %750 = vmatpush.bf16.msrb.mxu3 %v1237_v22  ;;  %v1241_v2 = vld [vmem:[#allocation8 + $0x18] sm:$0xff]  ;;  %v1239_v4 = vld [vmem:[#allocation8 + $0x8] sm:$0xff] }
  0x3a   :  { %638 = vmatpush.bf16.msrb.mxu0 %v1219_v51 }
  0x3b   :  { %652 = vmatpush.bf16.msrb.mxu1 %v1227_v52 }
  0x3c   :  { %835 = vmatpush.bf16.msra.mxu2 %v1245_v34 }
  0x3d   :  { %751 = vmatpush.bf16.msrb.mxu3 %v1236_v23 }
  0x3e   :  { %639 = vmatpush.bf16.msrb.mxu0 %v1218_v53 }
  0x3f   :  { %653 = vmatpush.bf16.msrb.mxu1 %v1226_v54 }
  0x40   :  { %836 = vmatpush.bf16.msra.mxu2 %v1244_v36 }
  0x41   :  { %752 = vmatpush.bf16.msrb.mxu3 %v1235_v24 }
  0x42   :  { %640 = vmatpush.bf16.msrb.mxu0 %v1217_v5  ;;  %v1238_v5 = vld [vmem:[#allocation8] sm:$0xff] }
  0x43   :  { %654 = vmatpush.bf16.msrb.mxu1 %v1225_v7  ;;  %v1258_v7 = vld [vmem:[%s1475_s4] ss:$0 sm:$0xff] }
  0x44   :  { %837 = vmatpush.bf16.msra.mxu2 %v1243_v41 }
  0x45   :  { %753 = vmatpush.bf16.msrb.mxu3 %v1234_v25 }
  0x46   :  { %641 = vmatpush.bf16.msrb.mxu0 %v1216_v8 }
  0x47   :  { %655 = vmatpush.bf16.msrb.mxu1 %v1224_v9  ;;  %1116 = vmatmul.msk.bf16.vlgmr.msrb.gmra.mxu2 %vm577_vm0, %v180_v13 }
  0x48   :  { %838 = vmatpush.bf16.msra.mxu2 %v1242_v45 }
  0x49   :  { %754 = vmatpush.bf16.msrb.mxu3 %v1233_v26 }
  0x4a   :  { %642 = vmatpush.bf16.msrb.mxu0 %v1215_v10 }
  0x4b   :  { %656 = vmatpush.bf16.msrb.mxu1 %v1223_v11 }
  0x4c   :  { %839 = vmatpush.bf16.msra.mxu2 %v1241_v2 }
  0x4d   :  { %755 = vmatpush.bf16.msrb.mxu3 %v1232_v27 }
  0x4e   :  { %643 = vmatpush.bf16.msrb.mxu0 %v1214_v14  ;;  %v1259_v14 = vld [vmem:[%s1477_s6] ss:$0 sm:$0xff] }
  0x4f   :  { %657 = vmatpush.bf16.msrb.mxu1 %v1222_v15 }
  0x50   :  { %840 = vmatpush.bf16.msra.mxu2 %v1240_v3 }
  0x51   :  { %756 = vmatpush.bf16.msrb.mxu3 %v1231_v28 }
  0x52   :  { %644 = vmatpush.bf16.msrb.mxu0 %v1213_v16 }
  0x53   :  { %658 = vmatpush.bf16.msrb.mxu1 %v1221_v18 }
  0x54   :  { %841 = vmatpush.bf16.msra.mxu2 %v1239_v4 }
  0x55   :  { %645 = vmatmul.bf16.vlgmr.msrb.gmra.mxu0 %v178_v20  ;;  %757 = vmatpush.bf16.msrb.mxu3 %v1230_v32 }
  0x56   :  { %659 = vmatmul.bf16.vlgmr.msrb.gmra.mxu1 %v179_v21 }
  0x58   :  { %842 = vmatpush.bf16.msra.mxu2 %v1238_v5 }
  0xb2   :  { %v590_v29 = vpop.f32.mrf.mxu0 }
  0xb3   :  { %v604_v31 = vpop.f32.mrf.mxu1  ;;  %v591_v35 = vadd.f32 %v1257_v33, %v590_v29 }
  0xb5   :  { %v605_v39 = vadd.f32 %v604_v31, %v591_v35 }
  0xba   :  { %v618_v30 = vpop.f32.mrf.mxu2  ;;  %v592_v37 = vpop.f32.mrf.mxu0 }
  0xbb   :  { %v606_v40 = vpop.f32.mrf.mxu1  ;;  %v632_v42 = vpop.f32.mrf.mxu3  ;;  %v593_v43 = vadd.f32 %v1257_v33, %v592_v37  ;;  %v619_v44 = vadd.f32 %v618_v30, %v605_v39 }
  0xbd   :  { %v607_v46 = vadd.f32 %v606_v40, %v593_v43  ;;  %v633_v48 = vadd.f32 %v632_v42, %v619_v44 }
  0xc2   :  { %v620_v38 = vpop.f32.mrf.mxu2 }
  0xc3   :  { %v621_v51 = vadd.f32 %v620_v38, %v607_v46  ;;  %v634_v53 = vpop.f32.mrf.mxu3 }
  0xc5   :  { %v635_v54 = vadd.f32 %v634_v53, %v621_v51 }
  0xca   :  { %v674_v50 = vpop.f32.mrf.mxu2 }
  0xd2   :  { %v646_v47 = vpop.f32.mrf.mxu0  ;;  %v676_v61 = vpop.f32.mrf.mxu2 }
  0xd3   :  { %v660_v49 = vpop.f32.mrf.mxu1  ;;  %v647_v52 = vadd.f32 %v646_v47, %v633_v48 }
  0xd5   :  { %v661_v55 = vadd.f32 %v660_v49, %v647_v52 }
  0xd7   :  { %v675_v59 = vadd.f32 %v674_v50, %v661_v55 }
  0xd9   :  { %v679_v63 = vmax.f32 %v675_v59, 0.0 }
  0xda   :  { %v648_v56 = vpop.f32.mrf.mxu0 }
  0xdb   :  { %v649_v57 = vadd.f32 %v648_v56, %v635_v54  ;;  %v662_v58 = vpop.f32.mrf.mxu1 }
  0xdd   :  { %v663_v60 = vadd.f32 %v662_v58, %v649_v57 }
  0xdf   :  { %v677_v62 = vadd.f32 %v676_v61, %v663_v60 }
  0xe1   :  { %v680_v0 = vmax.f32 %v677_v62, 0.0 }
  0xe3   :  { %v681_v1 = vpack.c.bf16 %v680_v0, %v679_v63 }
  0xe5   :  { %758 = vmatmul.bf16.vlgmr.msrb.gmra.mxu3 %v681_v1 }
 0x168   :  { %v759_v6 = vpop.f32.mrf.mxu3 }
 0x169   :  { %v760_v8 = vadd.f32 %v1258_v7, %v759_v6 }
 0x16b   :  { %v764_v11 = vmax.f32 %v760_v8, 0.0 }
 0x170   :  { %v761_v9 = vpop.f32.mrf.mxu3 }
 0x171   :  { %v762_v10 = vadd.f32 %v1258_v7, %v761_v9 }
 0x173   :  { %v765_v12 = vmax.f32 %v762_v10, 0.0 }
 0x175   :  { %v766_v13 = vpack.c.bf16 %v765_v12, %v764_v11 }
 0x177   :  { %843 = vmatmul.bf16.vlgmr.msra.gmra.mxu2 %v766_v13 }
 0x1fa   :  { %v844_v15 = vpop.f32.mrf.mxu2 }
 0x1fb   :  { %v845_v16 = vadd.f32 %v1259_v14, %v844_v15 }
 0x1fd   :  { %v849_v17 = vpack.c.bf16 %v845_v16, %v845_v16 }
 0x1ff   :  { %v853_v18 = vrot.slane %v849_v17, 3 }
 0x201   :  { %v858_v19 = vsel %vm855_vm1, %v849_v17, %v853_v18  ;;  %v860_v20 = vsel %vm859_vm2, %v849_v17, %v853_v18  ;;  %v864_v21 = vsel %vm863_vm3, %v849_v17, %v853_v18  ;;  %v868_v22 = vsel %vm867_vm4, %v849_v17, %v853_v18 }
 0x202   :  { %v862_v23 = vrot.slane %v860_v20, 1  ;;  %v866_v24 = vrot.slane %v864_v21, 2  ;;  %v870_v25 = vrot.slane %v868_v22, 3  ;;  %891 = vst [vmem:[#allocation10] sm:$0x1] %v858_v19  ;;  %v846_v26 = vpop.f32.mrf.mxu2 }
 0x203   :  { %v847_v27 = vadd.f32 %v1259_v14, %v846_v26 }
 0x204   :  { %892 = vst [vmem:[#allocation10 + $0x1] sm:$0x1] %v862_v23 }
 0x205   :  { %893 = vst [vmem:[#allocation10 + $0x2] sm:$0x1] %v866_v24  ;;  %v850_v28 = vpack.c.bf16 %v847_v27, %v847_v27 }
 0x206   :  { %894 = vst [vmem:[#allocation10 + $0x3] sm:$0x1] %v870_v25 }
 0x207   :  { %v854_v29 = vrot.slane %v850_v28, 3 }
 0x209   :  { %v873_v30 = vsel %vm855_vm1, %v850_v28, %v854_v29  ;;  %v874_v31 = vsel %vm859_vm2, %v850_v28, %v854_v29  ;;  %v877_v32 = vsel %vm863_vm3, %v850_v28, %v854_v29  ;;  %v880_v33 = vsel %vm867_vm4, %v850_v28, %v854_v29 }
 0x20a   :  { %v876_v34 = vrot.slane %v874_v31, 1  ;;  %v879_v35 = vrot.slane %v877_v32, 2  ;;  %v882_v36 = vrot.slane %v880_v33, 3  ;;  %895 = vst [vmem:[#allocation10 + $0x4] sm:$0x1] %v873_v30 }
 0x20c   :  { %896 = vst [vmem:[#allocation10 + $0x5] sm:$0x1] %v876_v34 }
 0x20d   :  { %897 = vst [vmem:[#allocation10 + $0x6] sm:$0x1] %v879_v35 }
 0x20e   :  { %898 = vst [vmem:[#allocation10 + $0x7] sm:$0x1] %v882_v36 }
 0x20f   :  { %902 = vsyncadd [#allocation4], 112  ;;  %s905_s26 = sshll.u32 %s1478_s7, 4  ;;  %s1396_s27 = smov [#allocation10]   ;;  %s906_s26 = int_to_ptr.hbm [resolvable:$true] %s905_s26 }
 0x210   :  { %s903_s28 = sshll.u32 %s1396_s27, 4  ;;  %s1397_s29 = smov 16   ;;  %s904_s28 = int_to_ptr.vmem [resolvable:$true] %s903_s28 }
 0x211   :  { %s1398_s30 = smov 1  }
 0x212   :  { %911 = dma.vmem_to_hbm [thread:$0]  %s904_s28, 16, %s906_s26, [#allocation4], %s1397_s29, %s1397_s29, %s1398_s30  }
 0x213   :  { %1386 = dma.done.wait [#allocation4], 128  }
 0x214   :  { %1387 = vsyncadd [#allocation4], 4294967168 }
 0x215   :  { %916 = vsyncpa [#allocation3], 1 }
 0x216   :  { %917 = vsyncpa [#allocation6], 1 }
 0x217   :  { %918 = vsyncpa [#allocation9], 1 }
 0x218   :  { %919 = vsyncpa [#allocation4], 1 }

</bundles_post_ra>
